<compile_context>
chip_gen: v5e
topology: v5e:2x2
jax: 0.10.0
libtpu: 0.0.40
codegen_flags: <defaults>
</compile_context>

<pallas_src>
import jax
import jax.numpy as jnp
from jax.experimental import pallas as pl
from jax.experimental.pallas import tpu as pltpu


def _round_up(n, m):
    return ((n + m - 1) // m) * m


def _vmem_capacity_bytes():
    """Per-core VMEM capacity (generation-aware), conservative fallback (v7x)."""
    try:
        return int(pltpu.get_tpu_info().vmem_capacity_bytes)
    except Exception:
        return 64 << 20


def mlp_kernel(x_ref, w1_ref, b1_ref, w2_ref, b2_ref, o_ref):
    # Layer 1: bf16 x bf16 matmul on the MXU with f32 accumulation; bias add
    # and ReLU stay in f32 on the VPU (v5e has no bf16 VPU).
    h = jnp.dot(x_ref[...], w1_ref[...], preferred_element_type=jnp.float32)
    h = jnp.maximum(h + b1_ref[...], 0.0)          # b1 is (1, Hp) -> broadcasts
    # Layer 2: cast the activation to the weight dtype so the second matmul
    # also runs at full bf16 MXU rate; accumulate in f32, output stays f32.
    h = h.astype(w2_ref.dtype)
    o_ref[...] = (
        jnp.dot(h, w2_ref[...], preferred_element_type=jnp.float32) + b2_ref[...]
    )


def prepare_params(w1, b1, w2, b2, *, param_dtype=jnp.bfloat16):
    """Pad + cast parameters ONCE (done at init, not per forward call).

    Weights become lane-dense bf16 (128-multiples); biases stay f32.
    Zero padding is exact for Linear + ReLU.
    """
    K, H = w1.shape
    C = w2.shape[1]
    Kp, Hp, Cp = _round_up(K, 128), _round_up(H, 128), _round_up(C, 128)
    f32 = jnp.float32
    w1p = jnp.zeros((Kp, Hp), param_dtype).at[:K, :H].set(w1.astype(param_dtype))
    b1p = jnp.zeros((1, Hp), f32).at[0, :H].set(b1.astype(f32))
    w2p = jnp.zeros((Hp, Cp), param_dtype).at[:H, :C].set(w2.astype(param_dtype))
    b2p = jnp.zeros((1, Cp), f32).at[0, :C].set(b2.astype(f32))
    return (w1p, b1p, w2p, b2p)


def simple_neural_net(x, params, *, num_classes, batch_block=None,
                      activation_dtype=jnp.bfloat16):
    """Fused forward of SimpleNeuralNet.

    x: (B, input_size); params: output of prepare_params(); returns
    (B, num_classes) float32.
    """
    w1p, b1p, w2p, b2p = params
    Kp, Hp = w1p.shape
    Cp = w2p.shape[1]
    B, K = x.shape
    C = num_classes
    f32 = jnp.float32

    vmem_cap = _vmem_capacity_bytes()
    usable = int(vmem_cap * 0.85)

    # Generation-aware batch tile: 512 on 128 MiB parts (v5e/v6e), 256 on v7x
    # (64 MiB per TC; each TC holds its own weight copy under megacore
    # sharding). Must stay a multiple of 16 (bf16 sublane packing); 256/512
    # also give full 256-row MXU passes on v6e/v7x.
    if batch_block is None:
        batch_block = 512 if vmem_cap >= (100 << 20) else 256
    batch_block = max(16, _round_up(batch_block, 16))

    act_isz = jnp.dtype(activation_dtype).itemsize
    weight_bytes = (w1p.size * w1p.dtype.itemsize
                    + w2p.size * w2p.dtype.itemsize
                    + b1p.size * 4 + b2p.size * 4)
    flops = 2 * B * (Kp * Hp + Hp * Cp)

    # ---------- small-batch / latency path: no grid, all resident in VMEM ----
    Bs = _round_up(max(B, 16), 16)
    small_bytes = (weight_bytes + Bs * Kp * act_isz + Bs * Cp * 4
                   + 2 * Bs * Hp * 4 + (2 << 20))
    if Bs <= batch_block and small_bytes <= usable:
        xp = jnp.zeros((Bs, Kp), activation_dtype).at[:B, :K].set(
            x.astype(activation_dtype))
        vmem_spec = pl.BlockSpec(memory_space=pltpu.MemorySpace.VMEM)
        out_p = pl.pallas_call(
            mlp_kernel,
            out_shape=jax.ShapeDtypeStruct((Bs, Cp), f32),
            in_specs=[vmem_spec] * 5,
            out_specs=vmem_spec,
            compiler_params=pltpu.CompilerParams(
                vmem_limit_bytes=int(min(vmem_cap, max(small_bytes, 16 << 20)))),
            cost_estimate=pl.CostEstimate(
                flops=flops, transcendentals=0,
                bytes_accessed=int(small_bytes - (2 << 20))),
        )(xp, w1p, b1p, w2p, b2p)
        return out_p[:B, :C]

    # ---------- large-batch path: tile the batch; weights stay resident ------
    tb = batch_block
    Bp = _round_up(max(B, tb), tb)          # pad ONCE, directly to the tile grid
    xp = jnp.zeros((Bp, Kp), activation_dtype).at[:B, :K].set(
        x.astype(activation_dtype))

    grid_bytes = (weight_bytes                       # single-copy resident weights
                  + 2 * tb * Kp * act_isz            # x tile, double-buffered
                  + 2 * tb * Cp * 4                  # out tile, double-buffered
                  + 2 * tb * Hp * 4                  # f32 hidden temp
                  + (2 << 20))
    # TODO(synk): if bf16 weights alone exceed the VMEM budget (huge hidden
    # sizes on v7x), add a second 'arbitrary' grid axis over the hidden dim
    # with an f32 accumulator scratch and pl.when init/finalize.

    resident = pl.BlockSpec(memory_space=pltpu.MemorySpace.VMEM)  # 1 copy, no pipeline
    out_p = pl.pallas_call(
        mlp_kernel,
        out_shape=jax.ShapeDtypeStruct((Bp, Cp), f32),
        grid=(Bp // tb,),
        in_specs=[
            pl.BlockSpec((tb, Kp), lambda i: (i, 0)),   # streamed batch tile
            resident,                                   # w1
            resident,                                   # b1
            resident,                                   # w2
            resident,                                   # b2
        ],
        out_specs=pl.BlockSpec((tb, Cp), lambda i: (i, 0)),  # lane-dense (Cp%128==0)
        compiler_params=pltpu.CompilerParams(
            dimension_semantics=("parallel",),
            vmem_limit_bytes=int(min(vmem_cap, max(grid_bytes, 32 << 20)))),
        cost_estimate=pl.CostEstimate(
            flops=flops, transcendentals=0,
            bytes_accessed=int(Bp * Kp * act_isz + weight_bytes + Bp * Cp * 4)),
    )(xp, w1p, b1p, w2p, b2p)
    return out_p[:B, :C]


if __name__ == "__main__":
    # Small shapes consistent with the module: flat-vector input MLP.
    batch, input_size, hidden_size, num_classes = 8, 64, 32, 16

    key = jax.random.PRNGKey(0)
    kx, kw1, kb1, kw2, kb2 = jax.random.split(key, 5)

    x = jax.random.normal(kx, (batch, input_size), dtype=jnp.float32)

    # Deterministic parameter init (PyTorch-style uniform(-1/sqrt(fan_in), +)).
    lim1 = 1.0 / (input_size ** 0.5)
    w1 = jax.random.uniform(kw1, (input_size, hidden_size), jnp.float32, -lim1, lim1)
    b1 = jax.random.uniform(kb1, (hidden_size,), jnp.float32, -lim1, lim1)
    lim2 = 1.0 / (hidden_size ** 0.5)
    w2 = jax.random.uniform(kw2, (hidden_size, num_classes), jnp.float32, -lim2, lim2)
    b2 = jax.random.uniform(kb2, (num_classes,), jnp.float32, -lim2, lim2)

    # Pad + cast parameters once (init-time), then run the fused forward.
    params = prepare_params(w1, b1, w2, b2)
    out = simple_neural_net(x, params, num_classes=num_classes)
    out = jax.block_until_ready(out)

    # Pure-JAX f32 reference; bf16 operands (f32 accumulation) -> loose tol.
    ref = jnp.maximum(x @ w1 + b1, 0.0) @ w2 + b2
    assert out.shape == (batch, num_classes)
    assert out.dtype == jnp.float32
    assert jnp.allclose(out, ref, atol=5e-2, rtol=5e-2)

    print("KERNEL_OK")
</pallas_src>

<mosaic_0001>
module attributes {stable_mosaic.version = 11 : i64} {
  func.func @mlp_kernel(%arg0: memref<16x128xbf16, #tpu.memory_space<vmem>>, %arg1: memref<128x128xbf16, #tpu.memory_space<vmem>>, %arg2: memref<1x128xf32, #tpu.memory_space<vmem>>, %arg3: memref<128x128xbf16, #tpu.memory_space<vmem>>, %arg4: memref<1x128xf32, #tpu.memory_space<vmem>>, %arg5: memref<16x128xf32, #tpu.memory_space<vmem>>) attributes {dimension_semantics = [], scalar_prefetch = 0 : i64, scratch_operands = 0 : i64, tpu.core_type = #tpu.core_type<tc>} {
    %c0 = arith.constant 0 : index
    %c0_0 = arith.constant 0 : index
    %0 = vector.load %arg0[%c0, %c0_0] : memref<16x128xbf16, #tpu.memory_space<vmem>>, vector<16x128xbf16>
    %c0_1 = arith.constant 0 : index
    %c0_2 = arith.constant 0 : index
    %1 = vector.load %arg1[%c0_1, %c0_2] : memref<128x128xbf16, #tpu.memory_space<vmem>>, vector<128x128xbf16>
    %cst = arith.constant dense<0.000000e+00> : vector<16x128xf32>
    %2 = tpu.matmul %0, %1, %cst {dimension_numbers = #tpu.dot_dimension_numbers<[1], [0], [0], [1], [0, 0, 1, 1], [], []>} : vector<16x128xbf16>, vector<128x128xbf16>, vector<16x128xf32> -> vector<16x128xf32>
    %c0_3 = arith.constant 0 : index
    %c0_4 = arith.constant 0 : index
    %3 = vector.load %arg2[%c0_3, %c0_4] : memref<1x128xf32, #tpu.memory_space<vmem>>, vector<1x128xf32>
    %4 = vector.broadcast %3 : vector<1x128xf32> to vector<16x128xf32>
    %5 = arith.addf %2, %4 : vector<16x128xf32>
    %cst_5 = arith.constant 0.000000e+00 : f32
    %6 = vector.broadcast %cst_5 : f32 to vector<16x128xf32>
    %7 = arith.maximumf %5, %6 : vector<16x128xf32>
    %8 = arith.truncf %7 : vector<16x128xf32> to vector<16x128xbf16>
    %c0_6 = arith.constant 0 : index
    %c0_7 = arith.constant 0 : index
    %9 = vector.load %arg3[%c0_6, %c0_7] : memref<128x128xbf16, #tpu.memory_space<vmem>>, vector<128x128xbf16>
    %cst_8 = arith.constant dense<0.000000e+00> : vector<16x128xf32>
    %10 = tpu.matmul %8, %9, %cst_8 {dimension_numbers = #tpu.dot_dimension_numbers<[1], [0], [0], [1], [0, 0, 1, 1], [], []>} : vector<16x128xbf16>, vector<128x128xbf16>, vector<16x128xf32> -> vector<16x128xf32>
    %c0_9 = arith.constant 0 : index
    %c0_10 = arith.constant 0 : index
    %11 = vector.load %arg4[%c0_9, %c0_10] : memref<1x128xf32, #tpu.memory_space<vmem>>, vector<1x128xf32>
    %12 = vector.broadcast %11 : vector<1x128xf32> to vector<16x128xf32>
    %13 = arith.addf %10, %12 : vector<16x128xf32>
    %c0_11 = arith.constant 0 : index
    %c0_12 = arith.constant 0 : index
    %14 = vector.load %arg5[%c0_11, %c0_12] : memref<16x128xf32, #tpu.memory_space<vmem>>, vector<16x128xf32>
    tpu.vector_store %arg5[%c0_11, %c0_12], %13 {strides = array<i32>} : memref<16x128xf32, #tpu.memory_space<vmem>>, vector<16x128xf32>,
    return
  }
}

</mosaic_0001>

<bundles_post_ra>
// kernel: tpu_custom_call.1
= control target key start
LH: loop header
LB: loop body
LE: loop exit
PB: predicated region body
PF: predicated region fallthrough
CT: control target
= control target key end

     0   :  { %10 = vsyncpa [#allocation3], 0  ;;  %s518_s0 = inlined_call_operand.hbm [shape: bf16[16,128], index: 0, kind: input, shape index: {}]   ;;  %s519_s1 = inlined_call_operand.hbm [shape: bf16[128,128], index: 1, kind: input, shape index: {}]   ;;  %s520_s2 = inlined_call_operand.vmem [shape: f32[1,128], index: 2, kind: input, shape index: {}]   ;;  %s521_s3 = inlined_call_operand.hbm [shape: bf16[128,128], index: 3, kind: input, shape index: {}]   ;;  %s522_s4 = inlined_call_operand.vmem [shape: f32[1,128], index: 4, kind: input, shape index: {}]   ;;  %s523_s5 = inlined_call_operand.hbm [shape: f32[16,128], index: 5, kind: output, shape index: {}]  }
   0x1   :  { %11 = vsyncpa [#allocation6], 0 }
   0x2   :  { %12 = vsyncpa [#allocation4], 0  ;;  %s30_s20 = sshll.u32 %s519_s1, 4  ;;  %s462_s21 = smov [#allocation5]   ;;  %s31_s20 = int_to_ptr.hbm [resolvable:$true] %s30_s20 }
   0x3   :  { %s32_s22 = sshll.u32 %s462_s21, 4  ;;  %s17_s25 = sshll.u32 %s518_s0, 4  ;;  %s33_s22 = int_to_ptr.vmem [resolvable:$true] %s32_s22  ;;  %s18_s25 = int_to_ptr.hbm [resolvable:$true] %s17_s25 }
   0x4   :  { %s463_s26 = smov 64   ;;  %s464_s27 = smov 4  }
   0x5   :  { %38 = dma.hbm_to_vmem [thread:$0]  %s31_s20, 1024, %s33_s22, [#allocation6], %s463_s26, %s463_s26, %s464_s27  }
   0x6   :  { %s465_s28 = smov [#allocation2]   ;;  %s45_s7 = sshll.u32 %s521_s3, 4  ;;  %s46_s7 = int_to_ptr.hbm [resolvable:$true] %s45_s7 }
   0x7   :  { %s19_s29 = sshll.u32 %s465_s28, 4  ;;  %s466_s1 = smov [#allocation7]   ;;  %s20_s29 = int_to_ptr.vmem [resolvable:$true] %s19_s29 }
   0x8   :  { %25 = dma.hbm_to_vmem [thread:$0]  %s18_s25, 128, %s20_s29, [#allocation3], %s463_s26, %s463_s26, %s464_s27  }
   0x9   :  { %s47_s8 = sshll.u32 %s466_s1, 4  ;;  %s48_s8 = int_to_ptr.vmem [resolvable:$true] %s47_s8 }
   0xa   :  { %53 = dma.hbm_to_vmem [thread:$0]  %s46_s7, 1024, %s48_s8, [#allocation6], %s463_s26, %s463_s26, %s464_s27  }
   0xb   :  { %456 = dma.done.wait [#allocation3], 128  }
   0xc   :  { %457 = vsyncadd [#allocation3], 4294967168 }
   0xd   :  { %458 = dma.done.wait [#allocation6], 2048  }
   0xe   :  { %459 = vsyncadd [#allocation6], 4294965248  ;;  %v341_v0 = vld [vmem:[#allocation5 + $0x38] sm:$0xff]  ;;  %v340_v1 = vld [vmem:[#allocation5 + $0x30] sm:$0xff]  ;;  %s467_s11 = smov [#allocation8]   ;;  %s468_s15 = smov 128  }
   0xf   :  { %144 = vmatpush.bf16.msra.mxu0 %v341_v0  ;;  %v349_v2 = vld [vmem:[#allocation7 + $0x38] sm:$0xff]  ;;  %v348_v3 = vld [vmem:[#allocation7 + $0x30] sm:$0xff]  ;;  %v339_v4 = vld [vmem:[#allocation5 + $0x28] sm:$0xff]  ;;  %s249_s12 = sshll.u32 %s467_s11, 4  ;;  %s469_s16 = smov 8   ;;  %s250_s12 = int_to_ptr.vmem [resolvable:$true] %s249_s12 }
  0x10   :  { %229 = vmatpush.bf16.msra.mxu1 %v349_v2  ;;  %v347_v5 = vld [vmem:[#allocation7 + $0x28] sm:$0xff]  ;;  %v338_v6 = vld [vmem:[#allocation5 + $0x20] sm:$0xff]  ;;  %v337_v8 = vld [vmem:[#allocation5 + $0x18] sm:$0xff] }
  0x11   :  { %v346_v7 = vld [vmem:[#allocation7 + $0x20] sm:$0xff]  ;;  %v336_v9 = vld [vmem:[#allocation5 + $0x10] sm:$0xff]  ;;  %v335_v10 = vld [vmem:[#allocation5 + $0x8] sm:$0xff] }
  0x12   :  { %v334_v11 = vld [vmem:[#allocation5] sm:$0xff]  ;;  %v333_v12 = vld [vmem:[#allocation2] sm:$0xff]  ;;  %v344_v14 = vld [vmem:[#allocation7 + $0x10] sm:$0xff] }
  0x13   :  { %145 = vmatpush.bf16.msra.mxu0 %v340_v1  ;;  %v345_v13 = vld [vmem:[#allocation7 + $0x18] sm:$0xff]  ;;  %v343_v15 = vld [vmem:[#allocation7 + $0x8] sm:$0xff]  ;;  %v342_v16 = vld [vmem:[#allocation7] sm:$0xff] }
  0x14   :  { %230 = vmatpush.bf16.msra.mxu1 %v348_v3  ;;  %v358_v18 = vld [vmem:[%s520_s2] ss:$0 sm:$0xff]  ;;  %s251_s2 = sshll.u32 %s523_s5, 4  ;;  %s252_s2 = int_to_ptr.hbm [resolvable:$true] %s251_s2 }
  0x15   :  { %v359_v25 = vld [vmem:[%s522_s4] ss:$0 sm:$0xff] }
  0x17   :  { %146 = vmatpush.bf16.msra.mxu0 %v339_v4 }
  0x18   :  { %231 = vmatpush.bf16.msra.mxu1 %v347_v5 }
  0x1b   :  { %147 = vmatpush.bf16.msra.mxu0 %v338_v6 }
  0x1c   :  { %232 = vmatpush.bf16.msra.mxu1 %v346_v7 }
  0x1f   :  { %148 = vmatpush.bf16.msra.mxu0 %v337_v8 }
  0x20   :  { %233 = vmatpush.bf16.msra.mxu1 %v345_v13 }
  0x23   :  { %149 = vmatpush.bf16.msra.mxu0 %v336_v9 }
  0x24   :  { %234 = vmatpush.bf16.msra.mxu1 %v344_v14 }
  0x27   :  { %150 = vmatpush.bf16.msra.mxu0 %v335_v10 }
  0x28   :  { %235 = vmatpush.bf16.msra.mxu1 %v343_v15 }
  0x2b   :  { %151 = vmatpush.bf16.msra.mxu0 %v334_v11 }
  0x2c   :  { %236 = vmatpush.bf16.msra.mxu1 %v342_v16 }
  0x2e   :  { %152 = vmatmul.bf16.vlgmr.msra.gmra.mxu0 %v333_v12 }
  0xab   :  { %v153_v17 = vpop.f32.mrf.mxu0 }
  0xac   :  { %v154_v19 = vadd.f32 %v358_v18, %v153_v17 }
  0xae   :  { %v158_v22 = vmax.f32 %v154_v19, 0.0 }
  0xb3   :  { %v155_v20 = vpop.f32.mrf.mxu0 }
  0xb4   :  { %v156_v21 = vadd.f32 %v358_v18, %v155_v20 }
  0xb6   :  { %v159_v23 = vmax.f32 %v156_v21, 0.0 }
  0xb8   :  { %v160_v24 = vpack.c.bf16 %v159_v23, %v158_v22 }
  0xba   :  { %237 = vmatmul.bf16.vlgmr.msra.gmra.mxu1 %v160_v24 }
 0x137   :  { %v238_v26 = vpop.f32.mrf.mxu1 }
 0x138   :  { %v239_v27 = vadd.f32 %v359_v25, %v238_v26 }
 0x13a   :  { %243 = vst [vmem:[#allocation8] sm:$0xff] %v239_v27 }
 0x13f   :  { %v240_v28 = vpop.f32.mrf.mxu1 }
 0x140   :  { %v241_v29 = vadd.f32 %v359_v25, %v240_v28 }
 0x142   :  { %244 = vst [vmem:[#allocation8 + $0x8] sm:$0xff] %v241_v29 }
 0x143   :  { %257 = dma.vmem_to_hbm [thread:$0]  %s250_s12, 256, %s252_s2, [#allocation4], %s468_s15, %s468_s15, %s469_s16  }
 0x144   :  { %460 = dma.done.wait [#allocation4], 256  }
 0x145   :  { %461 = vsyncadd [#allocation4], 4294967040 }
 0x146   :  { %262 = vsyncpa [#allocation3], 1 }
 0x147   :  { %263 = vsyncpa [#allocation6], 1 }
 0x148   :  { %264 = vsyncpa [#allocation4], 1 }

</bundles_post_ra>
